<compile_context>
chip_gen: v7x
topology: tpu7x:2x2x1
jax: 0.10.0
libtpu: 0.0.40
codegen_flags: <defaults>
</compile_context>

<pallas_src>
import functools

import jax
import jax.numpy as jnp
import numpy as np
from jax.experimental import pallas as pl
from jax.experimental.pallas import tpu as pltpu


def _round_up(a: int, b: int) -> int:
    return (a + b - 1) // b * b


def _mdn_kernel(x_ref, w_ref, b_ref, out_ref, *, num_mixtures, mu_end):
    """One row-tile of the fused MDN head.

    x_ref   : (tm, D_in)        input activations
    w_ref   : (D_in, N_pad)     fused [pi | mu | sigma | 0-pad] weights
    b_ref   : (1, N_pad)        fused bias (0 in the padded lanes)
    out_ref : (tm, N_pad)       fused [softmax(pi) | mu | exp(sigma) | pad]
    """
    x = x_ref[...]

    # Single MXU matmul + bias, fp32 accumulation.
    logits = jnp.dot(x, w_ref[...], preferred_element_type=jnp.float32)
    logits = logits + b_ref[...]

    tm, n_pad = logits.shape
    col = jax.lax.broadcasted_iota(jnp.int32, (tm, n_pad), 1)
    pi_mask = col < num_mixtures
    mu_mask = jnp.logical_and(col >= num_mixtures, col < mu_end)

    # Masked softmax over the pi columns only.
    pi_logits = jnp.where(pi_mask, logits, -jnp.inf)
    m = jnp.max(pi_logits, axis=-1, keepdims=True)
    e = jnp.where(pi_mask, jnp.exp(pi_logits - m), 0.0)
    denom = jnp.sum(e, axis=-1, keepdims=True)
    pi_vals = e * pl.reciprocal(denom, approx=False)  # exact: meets 1e-5 tol

    # Fused lane-dense output: pi | mu | exp(sigma) | (harmless pad lanes).
    out = jnp.where(pi_mask, pi_vals,
                    jnp.where(mu_mask, logits, jnp.exp(logits)))
    out_ref[...] = out.astype(out_ref.dtype)


def mdn_forward(x, weight, bias, num_mixtures, latent_dim, *, tm_max=512):
    """MDN forward.

    Args:
      x:      (batch, seq_len, input_dim) float32
      weight: (mdn_output_dim, input_dim)   -- PyTorch nn.Linear layout
      bias:   (mdn_output_dim,)
    Returns:
      pi    (batch, seq_len, num_mixtures)
      mu    (batch, seq_len, num_mixtures, latent_dim)
      sigma (batch, seq_len, num_mixtures, latent_dim)
    """
    batch, seq_len, input_dim = x.shape
    K, L = num_mixtures, latent_dim
    width = 1 + 2 * L
    KL = K * L
    out_width = K + 2 * KL
    assert weight.shape == (K * width, input_dim)

    # --- glue: de-interleave the Linear parameters into [pi | mu | sigma] ---
    w3 = weight.reshape(K, width, input_dim)
    w_pi = w3[:, 0, :]                               # (K, D_in)
    w_mu = w3[:, 1:1 + L, :].reshape(KL, input_dim)  # (K*L, D_in)
    w_sg = w3[:, 1 + L:, :].reshape(KL, input_dim)   # (K*L, D_in)
    w_cat = jnp.transpose(jnp.concatenate([w_pi, w_mu, w_sg], axis=0))  # (D_in, out_width)

    b3 = bias.reshape(K, width)
    b_cat = jnp.concatenate(
        [b3[:, 0], b3[:, 1:1 + L].reshape(KL), b3[:, 1 + L:].reshape(KL)])

    # Pad lane dim to a multiple of 128 -> unmasked (lane-dense) stores.
    n_pad = _round_up(out_width, 128)
    w_cat = jnp.pad(w_cat, ((0, 0), (0, n_pad - out_width)))
    b_cat = jnp.pad(b_cat, (0, n_pad - out_width)).reshape(1, n_pad)

    # --- flatten tokens, pad rows to a tile multiple --------------------------
    M = batch * seq_len
    tm = int(min(tm_max, _round_up(M, 8)))
    M_pad = _round_up(M, tm)
    x2 = x.reshape(M, input_dim)
    if M_pad != M:
        x2 = jnp.pad(x2, ((0, M_pad - M), (0, 0)))

    grid = (M_pad // tm,)

    # VMEM budget: double-buffered x + output tiles, resident fused weights/bias.
    itemsize = 4
    est = (2 * tm * input_dim + 2 * tm * n_pad
           + 2 * input_dim * n_pad + 2 * n_pad) * itemsize
    vmem_limit = int(min(max(2 * est, 8 << 20), 96 << 20))

    kernel = functools.partial(_mdn_kernel, num_mixtures=K, mu_end=K + KL)

    out_flat = pl.pallas_call(
        kernel,
        out_shape=jax.ShapeDtypeStruct((M_pad, n_pad), jnp.float32),
        grid_spec=pltpu.PrefetchScalarGridSpec(
            num_scalar_prefetch=0,
            grid=grid,
            in_specs=[
                pl.BlockSpec((tm, input_dim), lambda i: (i, 0)),   # x tile
                pl.BlockSpec((input_dim, n_pad), lambda i: (0, 0)),  # fused W
                pl.BlockSpec((1, n_pad), lambda i: (0, 0)),          # fused b
            ],
            out_specs=pl.BlockSpec((tm, n_pad), lambda i: (i, 0)),
        ),
        compiler_params=pltpu.CompilerParams(
            dimension_semantics=("parallel",),
            vmem_limit_bytes=vmem_limit),
    )(x2, w_cat, b_cat)

    # --- cheap XLA slices / reshapes outside the kernel -----------------------
    out_flat = out_flat[:M]
    pi = out_flat[:, :K].reshape(batch, seq_len, K)
    mu = out_flat[:, K:K + KL].reshape(batch, seq_len, K, L)
    sigma = out_flat[:, K + KL:out_width].reshape(batch, seq_len, K, L)
    return pi, mu, sigma


def _reference_forward(x, weight, bias, K, L):
    """Pure-JAX replica of the PyTorch forward (for verification)."""
    out = jnp.einsum("bsd,od->bso", x, weight) + bias
    b, s, _ = x.shape
    out = out.reshape(b, s, K, 1 + 2 * L)
    pi = jax.nn.softmax(out[..., 0], axis=-1)
    mu = out[..., 1:1 + L]
    sigma = jnp.exp(out[..., 1 + L:])
    return pi, mu, sigma


if __name__ == "__main__":
    # Small shapes consistent with the module's (batch, seq_len, input_dim) input.
    batch, seq_len, input_dim = 2, 8, 32
    latent_dim, num_mixtures = 8, 4
    mdn_output_dim = num_mixtures * (1 + 2 * latent_dim)   # 68

    key = jax.random.PRNGKey(0)
    kx, kw, kb = jax.random.split(key, 3)

    x = jax.random.normal(kx, (batch, seq_len, input_dim), dtype=jnp.float32)
    # Deterministic nn.Linear-style init (uniform in +-1/sqrt(fan_in)).
    bound = 1.0 / np.sqrt(input_dim)
    weight = jax.random.uniform(kw, (mdn_output_dim, input_dim),
                                minval=-bound, maxval=bound, dtype=jnp.float32)
    bias = jax.random.uniform(kb, (mdn_output_dim,),
                              minval=-bound, maxval=bound, dtype=jnp.float32)

    fwd = jax.jit(functools.partial(mdn_forward,
                                    num_mixtures=num_mixtures,
                                    latent_dim=latent_dim))
    pi, mu, sigma = fwd(x, weight, bias)
    jax.block_until_ready((pi, mu, sigma))

    # Verify against pure-JAX reference of the PyTorch semantics.
    pi_r, mu_r, sig_r = _reference_forward(x, weight, bias,
                                           num_mixtures, latent_dim)
    assert pi.shape == (batch, seq_len, num_mixtures)
    assert mu.shape == (batch, seq_len, num_mixtures, latent_dim)
    assert sigma.shape == (batch, seq_len, num_mixtures, latent_dim)
    assert jnp.allclose(pi, pi_r, atol=1e-5, rtol=1e-5)
    assert jnp.allclose(mu, mu_r, atol=1e-5, rtol=1e-5)
    assert jnp.allclose(sigma, sig_r, atol=1e-5, rtol=1e-5)
    assert jnp.allclose(jnp.sum(pi, axis=-1), 1.0, atol=1e-5)

    print("KERNEL_OK")
</pallas_src>

<mosaic_0001>
module attributes {stable_mosaic.version = 11 : i64} {
  func.func @_mdn_kernel(%arg0: i32, %arg1: memref<16x32xf32, #tpu.memory_space<vmem>>, %arg2: memref<32x128xf32, #tpu.memory_space<vmem>>, %arg3: memref<1x128xf32, #tpu.memory_space<vmem>>, %arg4: memref<16x128xf32, #tpu.memory_space<vmem>>) attributes {dimension_semantics = [#tpu.dimension_semantics<parallel>], iteration_bounds = array<i64: 1>, scalar_prefetch = 0 : i64, scratch_operands = 0 : i64, tpu.core_type = #tpu.core_type<tc>, window_params = [{transform_indices = @transform_0, window_bounds = array<i64: 16, 32>}, {pipeline_mode = #tpu.pipeline_mode<synchronous>, transform_indices = @transform_1, window_bounds = array<i64: 32, 128>}, {pipeline_mode = #tpu.pipeline_mode<synchronous>, transform_indices = @transform_2, window_bounds = array<i64: 1, 128>}, {transform_indices = @transform_3, window_bounds = array<i64: 16, 128>}]} {
    %c0 = arith.constant 0 : index
    %c0_0 = arith.constant 0 : index
    %0 = vector.load %arg1[%c0, %c0_0] : memref<16x32xf32, #tpu.memory_space<vmem>>, vector<16x32xf32>
    %c0_1 = arith.constant 0 : index
    %c0_2 = arith.constant 0 : index
    %1 = vector.load %arg2[%c0_1, %c0_2] : memref<32x128xf32, #tpu.memory_space<vmem>>, vector<32x128xf32>
    %cst = arith.constant dense<0.000000e+00> : vector<16x128xf32>
    %2 = tpu.matmul %0, %1, %cst {dimension_numbers = #tpu.dot_dimension_numbers<[1], [0], [0], [1], [0, 0, 1, 1], [], []>} : vector<16x32xf32>, vector<32x128xf32>, vector<16x128xf32> -> vector<16x128xf32>
    %c0_3 = arith.constant 0 : index
    %c0_4 = arith.constant 0 : index
    %3 = vector.load %arg3[%c0_3, %c0_4] : memref<1x128xf32, #tpu.memory_space<vmem>>, vector<1x128xf32>
    %4 = vector.broadcast %3 : vector<1x128xf32> to vector<16x128xf32>
    %5 = arith.addf %2, %4 : vector<16x128xf32>
    %6 = tpu.iota {dimensions = array<i32: 1>} : vector<16x128xi32>
    %c4_i32 = arith.constant 4 : i32
    %7 = vector.broadcast %c4_i32 : i32 to vector<16x128xi32>
    %8 = arith.cmpi slt, %6, %7 : vector<16x128xi32>
    %c4_i32_5 = arith.constant 4 : i32
    %9 = vector.broadcast %c4_i32_5 : i32 to vector<16x128xi32>
    %10 = arith.cmpi sge, %6, %9 : vector<16x128xi32>
    %c36_i32 = arith.constant 36 : i32
    %11 = vector.broadcast %c36_i32 : i32 to vector<16x128xi32>
    %12 = arith.cmpi slt, %6, %11 : vector<16x128xi32>
    %13 = arith.andi %10, %12 : vector<16x128xi1>
    %cst_6 = arith.constant 0xFF800000 : f32
    %14 = vector.broadcast %cst_6 : f32 to vector<16x128xf32>
    %15 = arith.select %8, %5, %14 : vector<16x128xi1>, vector<16x128xf32>
    %cst_7 = arith.constant dense<0xFF800000> : vector<16xf32>
    %16 = vector.multi_reduction <maximumf>, %15, %cst_7 [1] : vector<16x128xf32> to vector<16xf32>
    %17 = vector.shape_cast %16 : vector<16xf32> to vector<16x1xf32>
    %18 = vector.broadcast %17 : vector<16x1xf32> to vector<16x128xf32>
    %19 = arith.subf %15, %18 : vector<16x128xf32>
    %20 = math.exp %19 : vector<16x128xf32>
    %cst_8 = arith.constant 0.000000e+00 : f32
    %21 = vector.broadcast %cst_8 : f32 to vector<16x128xf32>
    %22 = arith.select %8, %20, %21 : vector<16x128xi1>, vector<16x128xf32>
    %cst_9 = arith.constant dense<0.000000e+00> : vector<16xf32>
    %23 = vector.multi_reduction <add>, %22, %cst_9 [1] : vector<16x128xf32> to vector<16xf32>
    %24 = vector.shape_cast %23 : vector<16xf32> to vector<16x1xf32>
    %25 = tpu.reciprocal %24 : vector<16x1xf32> -> vector<16x1xf32>
    %26 = vector.broadcast %25 : vector<16x1xf32> to vector<16x128xf32>
    %27 = arith.mulf %22, %26 : vector<16x128xf32>
    %28 = math.exp %5 : vector<16x128xf32>
    %29 = arith.select %13, %5, %28 : vector<16x128xi1>, vector<16x128xf32>
    %30 = arith.select %8, %27, %29 : vector<16x128xi1>, vector<16x128xf32>
    %c0_10 = arith.constant 0 : index
    %c0_11 = arith.constant 0 : index
    %31 = vector.load %arg4[%c0_10, %c0_11] : memref<16x128xf32, #tpu.memory_space<vmem>>, vector<16x128xf32>
    tpu.vector_store %arg4[%c0_10, %c0_11], %30 {strides = array<i32>} : memref<16x128xf32, #tpu.memory_space<vmem>>, vector<16x128xf32>,
    return
  }
  func.func @transform_0(%arg0: i32) -> (i32, i32) {
    %c0_i32 = arith.constant 0 : i32
    %c0_i32_0 = arith.constant 0 : i32
    return %arg0, %c0_i32 : i32, i32
  }
  func.func @transform_1(%arg0: i32) -> (i32, i32) {
    %c0_i32 = arith.constant 0 : i32
    %c0_i32_0 = arith.constant 0 : i32
    %c0_i32_1 = arith.constant 0 : i32
    return %c0_i32, %c0_i32_0 : i32, i32
  }
  func.func @transform_2(%arg0: i32) -> (i32, i32) {
    %c0_i32 = arith.constant 0 : i32
    %c0_i32_0 = arith.constant 0 : i32
    %c0_i32_1 = arith.constant 0 : i32
    return %c0_i32, %c0_i32_0 : i32, i32
  }
  func.func @transform_3(%arg0: i32) -> (i32, i32) {
    %c0_i32 = arith.constant 0 : i32
    %c0_i32_0 = arith.constant 0 : i32
    return %arg0, %c0_i32 : i32, i32
  }
}

</mosaic_0001>

<bundles_post_ra>
// kernel: mdn_forward.1
= control target key start
LH: loop header
LB: loop body
LE: loop exit
PB: predicated region body
PF: predicated region fallthrough
CT: control target
= control target key end

     0   :  { %vm27_vm0 = vcmask 261120   ;;  %v109_v8 = vlaneseq  ;;  %s252_s1 = inlined_call_operand.vmem [shape: f32[32,128], index: 1, kind: input, shape index: {}]   ;;  %s253_s0 = inlined_call_operand.vmem [shape: f32[16,32], index: 0, kind: input, shape index: {}]   ;;  %s254_s2 = inlined_call_operand.vmem [shape: f32[1,128], index: 2, kind: input, shape index: {}]   ;;  %s255_s3 = inlined_call_operand.vmem [shape: f32[16,128], index: 3, kind: output, shape index: {}]  }
   0x1   :  { %v16_v0 = vld [vmem:[%s252_s1] sm:$0xff]  ;;  %v17_v1 = vld [vmem:[%s252_s1 + $0x8] sm:$0xff]  ;;  %v18_v2 = vld [vmem:[%s252_s1 + $0x10] sm:$0xff] }
   0x2   :  { %v171_v3 = vpack.c.bf16 %v17_v1, %v16_v0  ;;  %v19_v4 = vld [vmem:[%s252_s1 + $0x18] sm:$0xff]  ;;  %v14_v5 = vld [vmem:[%s253_s0] sm:$0xff]  ;;  %v15_v7 = vld [vmem:[%s253_s0 + $0x8] sm:$0xff]  ;;  %v110_v9 = vand.u32 127, %v109_v8 }
   0x3   :  { %v175_v6 = vpack.c.bf16 %v19_v4, %v18_v2  ;;  %168 = vmatprep.mubr.msk.f32.mxu0 %vm27_vm0, %v14_v5  ;;  %v151_v10 = vld [vmem:[%s254_s2] ss:$0 sm:$0xff] }
   0x4   :  { %172 = vmatprep.subr.bf16.mxu0 %v171_v3  ;;  %vm111_vm1 = vcmp.lt.s32.totalorder %v110_v9, 4  ;;  %vm112_vm2 = vcmp.ge.s32.totalorder %v110_v9, 4  ;;  %vm113_vm3 = vcmp.lt.s32.totalorder %v110_v9, 36 }
   0x5   :  { %174 = vmatpush3.bf16.msra.mxu0 %v171_v3  ;;  %vm234_vm4 = vmand %vm112_vm2, %vm113_vm3 }
   0x6   :  { %176 = vmatprep.subr.bf16.mxu0 %v175_v6 }
   0x9   :  { %178 = vmatpush3.bf16.msra.mxu0 %v175_v6 }
   0xc   :  { %169 = vmatmul.mubr.msk.f32.vlgmr.msra.gmra.mrb[0].mxu0 %vm27_vm0, %v15_v7 }
  0xdf   :  { %v170_v11 = vpop.f32.mrb[0].mxu0 }
  0xe0   :  { %v106_v12 = vadd.f32 %v170_v11, %v151_v10  ;;  %v100_v13 = vpop.f32.mrb[1].mxu0 }
  0xe1   :  { %v101_v14 = vadd.f32 %v151_v10, %v100_v13 }
  0xe2   :  { %v139_v15 = vmul.f32 1.442695, %v106_v12  ;;  %v116_v18 = vsel %vm111_vm1, %v106_v12, -inf }
  0xe3   :  { %v137_v16 = vmul.f32 1.442695, %v101_v14  ;;  %v115_v17 = vsel %vm111_vm1, %v101_v14, -inf }
  0xe4   :  { %179 = vpow2.f32 %v139_v15  ;;  %117 = vmax.xlane.f32.xlu0 %v115_v17 }
  0xe5   :  { %181 = vpow2.f32 %v137_v16 }
  0xe8   :  { %119 = vmax.xlane.f32.xlu0 %v116_v18 }
  0xee   :  { %v180_v20 = vpop.eup %179 }
  0xef   :  { %v182_v21 = vpop.eup %181  ;;  %v142_v22 = vsel %vm234_vm4, %v106_v12, %v180_v20 }
  0xf0   :  { %v141_v23 = vsel %vm234_vm4, %v101_v14, %v182_v21 }
 0x171   :  { %v118_v24 = vpop.xlane.xlu0 %117 }
 0x172   :  { %v121_v25 = vsub.f32 %v115_v17, %v118_v24 }
 0x174   :  { %v123_v26 = vmul.f32 1.442695, %v121_v25 }
 0x175   :  { %v120_v27 = vpop.xlane.xlu0 %119 }
 0x176   :  { %183 = vpow2.f32 %v123_v26  ;;  %v122_v28 = vsub.f32 %v116_v18, %v120_v27 }
 0x178   :  { %v125_v29 = vmul.f32 1.442695, %v122_v28 }
 0x17a   :  { %185 = vpow2.f32 %v125_v29 }
 0x180   :  { %v184_v30 = vpop.eup %183 }
 0x181   :  { %v127_v31 = vsel %vm111_vm1, %v184_v30, 0.0 }
 0x182   :  { %129 = vadd.xlane.f32.xlu1 %v127_v31 }
 0x184   :  { %v186_v32 = vpop.eup %185 }
 0x185   :  { %v128_v33 = vsel %vm111_vm1, %v186_v32, 0.0 }
 0x186   :  { %131 = vadd.xlane.f32.xlu1 %v128_v33 }
 0x20f   :  { %v130_v34 = vpop.xlane.xlu1 %129 }
 0x210   :  { %187 = vrcp.f32 %v130_v34 }
 0x213   :  { %v132_v35 = vpop.xlane.xlu1 %131 }
 0x214   :  { %189 = vrcp.f32 %v132_v35 }
 0x21a   :  { %v188_v36 = vpop.eup %187 }
 0x21b   :  { %v135_v37 = vmul.f32 %v188_v36, %v127_v31 }
 0x21d   :  { %v143_v38 = vsel %vm111_vm1, %v135_v37, %v141_v23 }
 0x21e   :  { %v190_v39 = vpop.eup %189  ;;  %145 = vst [vmem:[%s255_s3] sm:$0xff] %v143_v38 }
 0x21f   :  { %v136_v40 = vmul.f32 %v190_v39, %v128_v33 }
 0x221   :  { %v144_v41 = vsel %vm111_vm1, %v136_v40, %v142_v22 }
 0x222   :  { %146 = vst [vmem:[%s255_s3 + $0x8] sm:$0xff] %v144_v41 }

</bundles_post_ra>
